<compile_context>
chip_gen: v5e
topology: v5e:2x2
jax: 0.10.0
libtpu: 0.0.40
codegen_flags: <defaults>
</compile_context>

<pallas_src>
import jax
import jax.numpy as jnp
from jax.experimental import pallas as pl
from jax.experimental.pallas import tpu as pltpu


def _unnormalize_kernel(mean_ref, std_ref, x_ref, o_ref):
    # mean_ref / std_ref: (rows_tile, 1) f32 in VMEM -> broadcast over lanes.
    # x_ref / o_ref:      (rows_tile, cols_tile) tiles in VMEM.
    x = x_ref[...].astype(jnp.float32)
    o_ref[...] = (x * std_ref[...] + mean_ref[...]).astype(o_ref.dtype)


def _round_up(v: int, m: int) -> int:
    return -(-v // m) * m


def _chip_kind() -> str:
    try:
        return jax.devices()[0].device_kind.lower()
    except Exception:  # pragma: no cover - defensive only
        return ""


def unnormalize(x: jax.Array, mean, std, *, donate_x: bool = False) -> jax.Array:
    """x: (N, C, H, W) float. Returns x * std[c] + mean[c] per channel."""
    N, C, H, W = x.shape
    mean_arr = jnp.asarray(mean, dtype=jnp.float32).reshape(C)
    std_arr = jnp.asarray(std, dtype=jnp.float32).reshape(C)

    R = N * C          # one row per (n, c) pair
    L = H * W          # flattened spatial extent on the lane axis
    x2 = x.reshape(R, L)
    # Row r corresponds to channel r % C -> tile the per-channel constants.
    mean_rows = jnp.tile(mean_arr, N).reshape(R, 1)
    std_rows = jnp.tile(std_arr, N).reshape(R, 1)

    itemsize = jnp.dtype(x.dtype).itemsize
    # Sublane packing unit: (8,128) f32, (16,128) bf16, (32,128) int8/fp8.
    sublane_unit = {4: 8, 2: 16, 1: 32}.get(itemsize, 8)

    # Generation-specific per-block byte budget and scoped-VMEM limit.
    kind = _chip_kind()
    if "v7" in kind:
        target_bytes = 6 * 1024 * 1024       # bigger blocks matter at 3.2 TB/s
        vmem_limit = 48 << 20                # v7x has only 64 MiB VMEM per TC
    elif "v6" in kind:
        target_bytes = 4 * 1024 * 1024
        vmem_limit = 64 << 20
    else:                                    # v5e / unknown: stay under 16 MiB default
        target_bytes = 2 * 1024 * 1024
        vmem_limit = None
    multi_core = ("v7" in kind) or ("v4" in kind)

    target_elems = max(1024, target_bytes // itemsize)

    # Lane axis: prefer a full-L block (one contiguous HBM stream per block)
    # whenever a sublane_unit-row block at full L fits the element budget.
    if L * sublane_unit <= target_elems or L <= 128:
        cols_tile = L                                       # full dim (always legal)
    else:
        cols_tile = max(128, (target_elems // sublane_unit // 128) * 128)

    # Sublane axis: largest multiple of sublane_unit within budget, or full R.
    rows_budget = max(
        sublane_unit,
        (target_elems // cols_tile) // sublane_unit * sublane_unit,
    )
    rows_tile = R if R <= rows_budget else rows_budget

    grid_r = pl.cdiv(R, rows_tile)
    grid_c = pl.cdiv(L, cols_tile)

    # Megacore: make sure at least 2 blocks exist along a "parallel" axis so
    # both TensorCores (and both DMA streams) participate.
    if multi_core and grid_r * grid_c < 2 and R >= 2 * sublane_unit:
        rows_tile = _round_up(pl.cdiv(R, 2), sublane_unit)
        grid_r = pl.cdiv(R, rows_tile)

    grid = (grid_r, grid_c)

    # Advisory cost hint: mem-bound elementwise (1 mul + 1 add per element).
    cost = pl.CostEstimate(
        flops=2 * R * L,
        transcendentals=0,
        bytes_accessed=2 * R * L * itemsize + 2 * R * 4,
    )

    cp_kwargs = dict(dimension_semantics=("parallel", "parallel"))
    if vmem_limit is not None:
        cp_kwargs["vmem_limit_bytes"] = vmem_limit

    call_kwargs = {}
    if donate_x:
        # Reuse x's HBM buffer for the output (caller must truly donate x).
        call_kwargs["input_output_aliases"] = {2: 0}

    out2 = pl.pallas_call(
        _unnormalize_kernel,
        out_shape=jax.ShapeDtypeStruct((R, L), x.dtype),
        grid=grid,
        in_specs=[
            pl.BlockSpec((rows_tile, 1), lambda i, j: (i, 0)),          # mean
            pl.BlockSpec((rows_tile, 1), lambda i, j: (i, 0)),          # std
            pl.BlockSpec((rows_tile, cols_tile), lambda i, j: (i, j)),  # x
        ],
        out_specs=pl.BlockSpec((rows_tile, cols_tile), lambda i, j: (i, j)),
        compiler_params=pltpu.CompilerParams(**cp_kwargs),
        cost_estimate=cost,
        **call_kwargs,
    )(mean_rows, std_rows, x2)

    return out2.reshape(N, C, H, W)


def _reference(x, mean, std):
    mean_b = jnp.asarray(mean, jnp.float32)[None, :, None, None].astype(x.dtype)
    std_b = jnp.asarray(std, jnp.float32)[None, :, None, None].astype(x.dtype)
    return x * std_b + mean_b


if __name__ == "__main__":
    key = jax.random.PRNGKey(0)

    # Primary case: matches the module's expected NCHW image input.
    N, C, H, W = 2, 4, 16, 16
    x = jax.random.normal(key, (N, C, H, W), dtype=jnp.float32)
    mean = (0.485, 0.456, 0.406, 0.5)[:C]
    std = (0.229, 0.224, 0.225, 0.25)[:C]

    out = unnormalize(x, mean, std)
    jax.block_until_ready(out)
    ref = _reference(x, mean, std)
    assert out.shape == (N, C, H, W)
    assert out.dtype == jnp.float32
    assert jnp.allclose(out, ref, atol=1e-6, rtol=1e-6)

    # Secondary case: odd channel count / non-8-multiple row count (robustness
    # of the cdiv/full-dim tiling path), still tiny.
    key2 = jax.random.PRNGKey(1)
    N2, C2, H2, W2 = 2, 3, 16, 16
    x2 = jax.random.normal(key2, (N2, C2, H2, W2), dtype=jnp.float32)
    mean2 = (0.485, 0.456, 0.406)
    std2 = (0.229, 0.224, 0.225)
    out2 = unnormalize(x2, mean2, std2)
    jax.block_until_ready(out2)
    ref2 = _reference(x2, mean2, std2)
    assert jnp.allclose(out2, ref2, atol=1e-6, rtol=1e-6)

    print("KERNEL_OK")
</pallas_src>

<mosaic_0001>
module attributes {stable_mosaic.version = 11 : i64} {
  func.func @_unnormalize_kernel(%arg0: i32, %arg1: i32, %arg2: memref<8x1xf32, #tpu.memory_space<vmem>>, %arg3: memref<8x1xf32, #tpu.memory_space<vmem>>, %arg4: memref<8x256xf32, #tpu.memory_space<vmem>>, %arg5: memref<8x256xf32, #tpu.memory_space<vmem>>) attributes {dimension_semantics = [#tpu.dimension_semantics<parallel>, #tpu.dimension_semantics<parallel>], iteration_bounds = array<i64: 1, 1>, scalar_prefetch = 0 : i64, scratch_operands = 0 : i64, tpu.core_type = #tpu.core_type<tc>, window_params = [{transform_indices = @transform_0, window_bounds = array<i64: 8, 1>}, {transform_indices = @transform_1, window_bounds = array<i64: 8, 1>}, {transform_indices = @transform_2, window_bounds = array<i64: 8, 256>}, {transform_indices = @transform_3, window_bounds = array<i64: 8, 256>}]} {
    %c0 = arith.constant 0 : index
    %c0_0 = arith.constant 0 : index
    %0 = vector.load %arg4[%c0, %c0_0] : memref<8x256xf32, #tpu.memory_space<vmem>>, vector<8x256xf32>
    %c0_1 = arith.constant 0 : index
    %c0_2 = arith.constant 0 : index
    %1 = vector.load %arg3[%c0_1, %c0_2] : memref<8x1xf32, #tpu.memory_space<vmem>>, vector<8x1xf32>
    %2 = vector.broadcast %1 : vector<8x1xf32> to vector<8x256xf32>
    %3 = arith.mulf %0, %2 : vector<8x256xf32>
    %c0_3 = arith.constant 0 : index
    %c0_4 = arith.constant 0 : index
    %4 = vector.load %arg2[%c0_3, %c0_4] : memref<8x1xf32, #tpu.memory_space<vmem>>, vector<8x1xf32>
    %5 = vector.broadcast %4 : vector<8x1xf32> to vector<8x256xf32>
    %6 = arith.addf %3, %5 : vector<8x256xf32>
    %c0_5 = arith.constant 0 : index
    %c0_6 = arith.constant 0 : index
    %7 = vector.load %arg5[%c0_5, %c0_6] : memref<8x256xf32, #tpu.memory_space<vmem>>, vector<8x256xf32>
    tpu.vector_store %arg5[%c0_5, %c0_6], %6 {strides = array<i32>} : memref<8x256xf32, #tpu.memory_space<vmem>>, vector<8x256xf32>,
    return
  }
  func.func @transform_0(%arg0: i32, %arg1: i32) -> (i32, i32) {
    %c0_i32 = arith.constant 0 : i32
    %c0_i32_0 = arith.constant 0 : i32
    return %arg0, %c0_i32 : i32, i32
  }
  func.func @transform_1(%arg0: i32, %arg1: i32) -> (i32, i32) {
    %c0_i32 = arith.constant 0 : i32
    %c0_i32_0 = arith.constant 0 : i32
    return %arg0, %c0_i32 : i32, i32
  }
  func.func @transform_2(%arg0: i32, %arg1: i32) -> (i32, i32) {
    %c0_i32 = arith.constant 0 : i32
    return %arg0, %arg1 : i32, i32
  }
  func.func @transform_3(%arg0: i32, %arg1: i32) -> (i32, i32) {
    %c0_i32 = arith.constant 0 : i32
    return %arg0, %arg1 : i32, i32
  }
}

</mosaic_0001>

<bundles_post_ra>
// kernel: tpu_custom_call.1
= control target key start
LH: loop header
LB: loop body
LE: loop exit
PB: predicated region body
PF: predicated region fallthrough
CT: control target
= control target key end

     0   :  { %s117_s0 = inlined_call_operand.vmem [shape: f32[8,1], index: 0, kind: input, shape index: {}]   ;;  %s118_s1 = inlined_call_operand.vmem [shape: f32[8,1], index: 1, kind: input, shape index: {}]   ;;  %s119_s2 = inlined_call_operand.vmem [shape: f32[8,256], index: 2, kind: input, shape index: {}]   ;;  %s120_s3 = inlined_call_operand.hbm [shape: f32[8,256], index: 3, kind: output, shape index: {}]  }
   0x1   :  { %v17_v0 = vld [vmem:[%s118_s1] sm:$0xff] }
   0x2   :  { %8 = vsyncpa [#allocation3], 0  ;;  %v80_v1 = vmov 0   ;;  %v25_v2 = vld [vmem:[%s117_s0] sm:$0xff]  ;;  %v16_v5 = vld [vmem:[%s119_s2 + $0x8] sm:$0xff]  ;;  %s81_s1 = smov [#allocation2]  }
   0x3   :  { %53 = vset.pattern.permute.xlu0 %v80_v1  ;;  %v15_v4 = vld [vmem:[%s119_s2] sm:$0xff]  ;;  %s40_s20 = sshll.u32 %s81_s1, 4  ;;  %s42_s23 = sshll.u32 %s120_s3, 4  ;;  %s41_s20 = int_to_ptr.vmem [resolvable:$true] %s40_s20  ;;  %s43_s23 = int_to_ptr.hbm [resolvable:$true] %s42_s23 }
   0x4   :  { %20 = vperm.xlu0 %53, %v17_v0  }
   0xc   :  { %28 = vperm.xlu0 %53, %v25_v2  }
  0x76   :  { %v21_v3 = vpop.permute.xlu0 %20 }
  0x77   :  { %v23_v6 = vmul.f32 %v21_v3, %v15_v4  ;;  %v24_v7 = vmul.f32 %v21_v3, %v16_v5 }
  0x7e   :  { %v29_v8 = vpop.permute.xlu0 %28 }
  0x7f   :  { %v31_v9 = vadd.f32 %v29_v8, %v23_v6  ;;  %v32_v10 = vadd.f32 %v29_v8, %v24_v7 }
  0x81   :  { %33 = vst [vmem:[#allocation2] sm:$0xff] %v31_v9 }
  0x82   :  { %34 = vst [vmem:[#allocation2 + $0x8] sm:$0xff] %v32_v10 }
  0x83   :  { %45 = dma.vmem_to_hbm [thread:$0]  %s41_s20, 256, %s43_s23, [#allocation3]  }
  0x84   :  { %78 = dma.done.wait [#allocation3], 256  }
  0x85   :  { %79 = vsyncadd [#allocation3], 4294967040 }
  0x86   :  { %50 = vsyncpa [#allocation3], 1 }

</bundles_post_ra>
